<compile_context>
chip_gen: v5e
topology: v5e:2x2
jax: 0.10.0
libtpu: 0.0.40
codegen_flags: <defaults>
</compile_context>

<pallas_src>
import functools
import math

import jax
import jax.numpy as jnp
from jax.experimental import pallas as pl
from jax.experimental.pallas import tpu as pltpu


def eca_kernel_size(channels, gamma=2, b=1):
    """Same formula as the PyTorch module."""
    t = int(abs((math.log(channels, 2) + b) / gamma))
    return t if t % 2 else t + 1


# Aligned left margin (one full 8-sublane tile) used for the conv's zero padding,
# so the store of the channel sums into the padded scratch stays tile-aligned.
_PADL = 8


def _eca_kernel(w_ref, x_ref, o_ref, acc_ref, buf_ref, *, C, k, pad):
    # w_ref  : (k,) f32 in SMEM  -- Conv1d taps with 1/(H*W) pre-folded
    # x_ref  : (TB, C, tHW)      -- block of x (channels on sublanes, pixels on lanes)
    # o_ref  : (TB, C, 1)        -- per-channel attention mask for TB images
    # acc_ref: (TB, C, 1) f32    -- running channel sums (VMEM scratch)
    # buf_ref: (TB, C+_PADL+pad, 1) f32 -- zero-padded sums for the banded conv
    h = pl.program_id(1)

    @pl.when(h == 0)
    def _init():
        acc_ref[...] = jnp.zeros_like(acc_ref)

    # f32 accumulation; the cast fuses into the lane (H*W) reduction.
    acc_ref[...] += jnp.sum(x_ref[...], axis=-1, keepdims=True, dtype=jnp.float32)

    @pl.when(h == pl.num_programs(1) - 1)
    def _finalize():
        # Zero-padded copy of the channel sums (left margin is tile-aligned).
        buf_ref[...] = jnp.zeros_like(buf_ref)
        buf_ref[:, _PADL:_PADL + C, :] = acc_ref[...]
        # Banded Conv1d over channels: k shifted sublane windows * scalar taps.
        #   z[c] = sum_j w[j] * y[c + j - pad]   (zero outside [0, C))
        off0 = _PADL - pad
        z = w_ref[0] * buf_ref[:, off0:off0 + C, :]
        for j in range(1, k):
            off = _PADL - pad + j
            z = z + w_ref[j] * buf_ref[:, off:off + C, :]
        o_ref[...] = jax.nn.sigmoid(z).astype(o_ref.dtype)


def _pick_hw_chunk(HW, target_elems=2048):
    """Largest multiple-of-128 divisor of HW that is <= target, else HW whole."""
    if HW <= target_elems or HW % 128 != 0:
        return HW
    for t in range(target_elems - (target_elems % 128), 127, -128):
        if HW % t == 0:
            return t
    return HW


def _pick_batch_block(N, C, tHW, itemsize,
                      target_bytes=2 << 20, max_scratch_elems=4096):
    """Images per grid step: ~1-2 MiB DMAs, bounded f32 scratch, divides N."""
    per_image = C * tHW * itemsize
    tb = int(max(1, min(N, target_bytes // max(per_image, 1),
                        max(1, max_scratch_elems // max(C, 1)))))
    while N % tb:
        tb -= 1
    return tb


def eca_forward(x_nchw, conv_w):
    """ECA forward. x_nchw: (N, C, H, W); conv_w: (k,) Conv1d weight (no bias).
    Returns the attention mask with shape (N, C, 1, 1), dtype of x."""
    N, C, H, W = x_nchw.shape
    HW = H * W
    k = int(conv_w.shape[0])
    pad = (k - 1) // 2

    x3 = x_nchw.reshape(N, C, HW)                      # free reshape, no transpose
    taps = conv_w.astype(jnp.float32) / float(HW)      # fold the mean into the taps

    itemsize = jnp.dtype(x_nchw.dtype).itemsize
    tHW = _pick_hw_chunk(HW)
    nh = HW // tHW
    TB = _pick_batch_block(N, C, tHW, itemsize)
    nb = N // TB

    kernel = functools.partial(_eca_kernel, C=C, k=k, pad=pad)

    if nh >= 4:
        # Deeper input pipelining when streaming many HW chunks (pure DMA loop).
        x_spec = pl.BlockSpec((TB, C, tHW), lambda b, h: (b, 0, h),
                              pipeline_mode=pl.Buffered(3))
    else:
        x_spec = pl.BlockSpec((TB, C, tHW), lambda b, h: (b, 0, h))

    cost = pl.CostEstimate(
        flops=int(N * C * HW + 2 * N * C * k),
        transcendentals=int(N * C),
        bytes_accessed=int(N * C * HW * itemsize + N * C * itemsize + k * 4),
    )

    out = pl.pallas_call(
        kernel,
        out_shape=jax.ShapeDtypeStruct((N, C, 1), x_nchw.dtype),
        grid_spec=pltpu.PrefetchScalarGridSpec(
            num_scalar_prefetch=0,
            grid=(nb, nh),                               # reduction (HW) axis last
            in_specs=[
                pl.BlockSpec(memory_space=pltpu.MemorySpace.SMEM),   # conv taps
                x_spec,
            ],
            out_specs=pl.BlockSpec((TB, C, 1), lambda b, h: (b, 0, 0)),
            scratch_shapes=[
                pltpu.VMEM((TB, C, 1), jnp.float32),                 # channel sums
                pltpu.VMEM((TB, C + _PADL + pad, 1), jnp.float32),   # padded sums
            ],
        ),
        compiler_params=pltpu.CompilerParams(
            dimension_semantics=("parallel", "arbitrary")),
        cost_estimate=cost,
    )(taps, x3)

    return out.reshape(N, C, 1, 1)                      # free reshape (same order)


def eca_reference(x_nchw, conv_w):
    """Pure-JAX reference mirroring the PyTorch forward (cross-correlation,
    zero padding, no bias)."""
    xf = x_nchw.astype(jnp.float32)
    N, C, H, W = xf.shape
    y = jnp.mean(xf, axis=(2, 3))                       # (N, C) global avg pool
    k = conv_w.shape[0]
    pad = (k - 1) // 2
    yp = jnp.pad(y, ((0, 0), (pad, pad)))
    z = sum(conv_w[j].astype(jnp.float32) * yp[:, j:j + C] for j in range(k))
    mask = jax.nn.sigmoid(z)
    return mask.reshape(N, C, 1, 1).astype(x_nchw.dtype)


if __name__ == "__main__":
    key = jax.random.PRNGKey(0)
    k_x, k_w = jax.random.split(key)

    # channels=32 -> ECA kernel size k=3 (the canonical non-degenerate case).
    N, C, H, W = 2, 32, 16, 16
    ksz = eca_kernel_size(C)                            # == 3
    x = jax.random.normal(k_x, (N, C, H, W), jnp.float32)
    conv_w = 0.5 * jax.random.normal(k_w, (ksz,), jnp.float32)

    out = jax.block_until_ready(eca_forward(x, conv_w))
    ref = jax.block_until_ready(eca_reference(x, conv_w))
    assert out.shape == (N, C, 1, 1), out.shape
    assert jnp.allclose(out, ref, atol=1e-5, rtol=1e-5), (
        float(jnp.max(jnp.abs(out - ref))))

    # bf16 I/O path (f32 accumulation inside the kernel).
    xb = x.astype(jnp.bfloat16)
    out_b = jax.block_until_ready(eca_forward(xb, conv_w))
    ref_b = eca_reference(xb, conv_w)
    assert out_b.dtype == jnp.bfloat16
    assert jnp.allclose(out_b.astype(jnp.float32), ref_b.astype(jnp.float32),
                        atol=1e-2, rtol=1e-2), (
        float(jnp.max(jnp.abs(out_b.astype(jnp.float32) - ref_b.astype(jnp.float32)))))

    print("KERNEL_OK")
</pallas_src>

<mosaic_0001>
module attributes {stable_mosaic.version = 11 : i64} {
  func.func @_eca_kernel(%arg0: i32, %arg1: i32, %arg2: memref<3xf32, #tpu.memory_space<smem>>, %arg3: memref<2x32x256xf32, #tpu.memory_space<vmem>>, %arg4: memref<2x32x1xf32, #tpu.memory_space<vmem>>, %arg5: memref<2x32x1xf32, #tpu.memory_space<vmem>>, %arg6: memref<2x41x1xf32, #tpu.memory_space<vmem>>) attributes {dimension_semantics = [#tpu.dimension_semantics<parallel>, #tpu.dimension_semantics<arbitrary>], iteration_bounds = array<i64: 1, 1>, scalar_prefetch = 0 : i64, scratch_operands = 2 : i64, tpu.core_type = #tpu.core_type<tc>, window_params = [{transform_indices = @transform_0, window_bounds = array<i64: 3>}, {transform_indices = @transform_1, window_bounds = array<i64: 2, 32, 256>}, {transform_indices = @transform_2, window_bounds = array<i64: 2, 32, 1>}]} {
    %c0_i32 = arith.constant 0 : i32
    %0 = arith.cmpi eq, %arg1, %c0_i32 : i32
    %1 = arith.extui %0 : i1 to i32
    %c0_i32_0 = arith.constant 0 : i32
    %2 = arith.cmpi ne, %1, %c0_i32_0 : i32
    scf.if %2 {
      %cst_11 = arith.constant 0.000000e+00 : f32
      %12 = vector.broadcast %cst_11 : f32 to vector<2x32x1xf32>
      %c0_12 = arith.constant 0 : index
      %c0_13 = arith.constant 0 : index
      %c0_14 = arith.constant 0 : index
      %13 = vector.load %arg5[%c0_12, %c0_13, %c0_14] : memref<2x32x1xf32, #tpu.memory_space<vmem>>, vector<2x32x1xf32>
      tpu.vector_store %arg5[%c0_12, %c0_13, %c0_14], %12 {strides = array<i32>} : memref<2x32x1xf32, #tpu.memory_space<vmem>>, vector<2x32x1xf32>,
    } else {
    }
    %c0 = arith.constant 0 : index
    %c0_1 = arith.constant 0 : index
    %c0_2 = arith.constant 0 : index
    %3 = vector.load %arg5[%c0, %c0_1, %c0_2] : memref<2x32x1xf32, #tpu.memory_space<vmem>>, vector<2x32x1xf32>
    %c0_3 = arith.constant 0 : index
    %c0_4 = arith.constant 0 : index
    %c0_5 = arith.constant 0 : index
    %4 = vector.load %arg3[%c0_3, %c0_4, %c0_5] : memref<2x32x256xf32, #tpu.memory_space<vmem>>, vector<2x32x256xf32>
    %cst = arith.constant dense<0.000000e+00> : vector<2x32xf32>
    %5 = vector.multi_reduction <add>, %4, %cst [2] : vector<2x32x256xf32> to vector<2x32xf32>
    %6 = vector.shape_cast %5 : vector<2x32xf32> to vector<2x32x1xf32>
    %7 = arith.addf %3, %6 : vector<2x32x1xf32>
    %c0_6 = arith.constant 0 : index
    %c0_7 = arith.constant 0 : index
    %c0_8 = arith.constant 0 : index
    %8 = vector.load %arg5[%c0_6, %c0_7, %c0_8] : memref<2x32x1xf32, #tpu.memory_space<vmem>>, vector<2x32x1xf32>
    tpu.vector_store %arg5[%c0_6, %c0_7, %c0_8], %7 {strides = array<i32>} : memref<2x32x1xf32, #tpu.memory_space<vmem>>, vector<2x32x1xf32>,
    %c0_i32_9 = arith.constant 0 : i32
    %9 = arith.cmpi eq, %arg1, %c0_i32_9 : i32
    %10 = arith.extui %9 : i1 to i32
    %c0_i32_10 = arith.constant 0 : i32
    %11 = arith.cmpi ne, %10, %c0_i32_10 : i32
    scf.if %11 {
      %cst_11 = arith.constant 0.000000e+00 : f32
      %12 = vector.broadcast %cst_11 : f32 to vector<2x41x1xf32>
      %c0_12 = arith.constant 0 : index
      %c0_13 = arith.constant 0 : index
      %c0_14 = arith.constant 0 : index
      %13 = vector.load %arg6[%c0_12, %c0_13, %c0_14] : memref<2x41x1xf32, #tpu.memory_space<vmem>>, vector<2x41x1xf32>
      tpu.vector_store %arg6[%c0_12, %c0_13, %c0_14], %12 {strides = array<i32>} : memref<2x41x1xf32, #tpu.memory_space<vmem>>, vector<2x41x1xf32>,
      %c0_15 = arith.constant 0 : index
      %c0_16 = arith.constant 0 : index
      %c0_17 = arith.constant 0 : index
      %14 = vector.load %arg5[%c0_15, %c0_16, %c0_17] : memref<2x32x1xf32, #tpu.memory_space<vmem>>, vector<2x32x1xf32>
      %c0_18 = arith.constant 0 : index
      %c8 = arith.constant 8 : index
      %c0_19 = arith.constant 0 : index
      %15 = vector.load %arg6[%c0_18, %c8, %c0_19] : memref<2x41x1xf32, #tpu.memory_space<vmem>>, vector<2x32x1xf32>
      tpu.vector_store %arg6[%c0_18, %c8, %c0_19], %14 {strides = array<i32>} : memref<2x41x1xf32, #tpu.memory_space<vmem>>, vector<2x32x1xf32>,
      %c0_20 = arith.constant 0 : index
      %16 = memref.load %arg2[%c0_20] : memref<3xf32, #tpu.memory_space<smem>>
      %c0_21 = arith.constant 0 : index
      %c7 = arith.constant 7 : index
      %c0_22 = arith.constant 0 : index
      %17 = vector.load %arg6[%c0_21, %c7, %c0_22] : memref<2x41x1xf32, #tpu.memory_space<vmem>>, vector<2x32x1xf32>
      %18 = vector.broadcast %16 : f32 to vector<2x32x1xf32>
      %19 = arith.mulf %18, %17 : vector<2x32x1xf32>
      %c1 = arith.constant 1 : index
      %20 = memref.load %arg2[%c1] : memref<3xf32, #tpu.memory_space<smem>>
      %c0_23 = arith.constant 0 : index
      %c8_24 = arith.constant 8 : index
      %c0_25 = arith.constant 0 : index
      %21 = vector.load %arg6[%c0_23, %c8_24, %c0_25] : memref<2x41x1xf32, #tpu.memory_space<vmem>>, vector<2x32x1xf32>
      %22 = vector.broadcast %20 : f32 to vector<2x32x1xf32>
      %23 = arith.mulf %22, %21 : vector<2x32x1xf32>
      %24 = arith.addf %19, %23 : vector<2x32x1xf32>
      %c2 = arith.constant 2 : index
      %25 = memref.load %arg2[%c2] : memref<3xf32, #tpu.memory_space<smem>>
      %c0_26 = arith.constant 0 : index
      %c9 = arith.constant 9 : index
      %c0_27 = arith.constant 0 : index
      %26 = vector.load %arg6[%c0_26, %c9, %c0_27] : memref<2x41x1xf32, #tpu.memory_space<vmem>>, vector<2x32x1xf32>
      %27 = vector.broadcast %25 : f32 to vector<2x32x1xf32>
      %28 = arith.mulf %27, %26 : vector<2x32x1xf32>
      %29 = arith.addf %24, %28 : vector<2x32x1xf32>
      %30 = arith.negf %29 : vector<2x32x1xf32>
      %31 = math.exp %30 : vector<2x32x1xf32>
      %cst_28 = arith.constant 1.000000e+00 : f32
      %32 = vector.broadcast %cst_28 : f32 to vector<2x32x1xf32>
      %33 = arith.addf %32, %31 : vector<2x32x1xf32>
      %34 = arith.divf %32, %33 : vector<2x32x1xf32>
      %c0_29 = arith.constant 0 : index
      %c0_30 = arith.constant 0 : index
      %c0_31 = arith.constant 0 : index
      %35 = vector.load %arg4[%c0_29, %c0_30, %c0_31] : memref<2x32x1xf32, #tpu.memory_space<vmem>>, vector<2x32x1xf32>
      tpu.vector_store %arg4[%c0_29, %c0_30, %c0_31], %34 {strides = array<i32>} : memref<2x32x1xf32, #tpu.memory_space<vmem>>, vector<2x32x1xf32>,
    } else {
    }
    return
  }
  func.func @transform_0(%arg0: i32, %arg1: i32) -> i32 {
    %c0_i32 = arith.constant 0 : i32
    %c0_i32_0 = arith.constant 0 : i32
    return %c0_i32 : i32
  }
  func.func @transform_1(%arg0: i32, %arg1: i32) -> (i32, i32, i32) {
    %c0_i32 = arith.constant 0 : i32
    %c0_i32_0 = arith.constant 0 : i32
    return %arg0, %c0_i32, %arg1 : i32, i32, i32
  }
  func.func @transform_2(%arg0: i32, %arg1: i32) -> (i32, i32, i32) {
    %c0_i32 = arith.constant 0 : i32
    %c0_i32_0 = arith.constant 0 : i32
    %c0_i32_1 = arith.constant 0 : i32
    return %arg0, %c0_i32, %c0_i32_0 : i32, i32, i32
  }
}

</mosaic_0001>

<bundles_post_ra>
// kernel: tpu_custom_call.1
= control target key start
LH: loop header
LB: loop body
LE: loop exit
PB: predicated region body
PF: predicated region fallthrough
CT: control target
= control target key end

     0   :  { %7 = vsyncpa [#allocation6], 0  ;;  %s679_s0 = inlined_call_operand.hbm [shape: f32[3], index: 0, kind: input, shape index: {}]   ;;  %s680_s1 = inlined_call_operand.hbm [shape: f32[2,32,256], index: 1, kind: input, shape index: {}]   ;;  %s681_s2 = inlined_call_operand.vmem [shape: f32[2,32,1], index: 2, kind: output, shape index: {}]  }
   0x1   :  { %s14_s11 = sshll.u32 %s679_s0, 4  ;;  %s15_s11 = int_to_ptr.hbm [resolvable:$true] %s14_s11 }
   0x2   :  { %8 = vsyncpa [#allocation5], 0  ;;  %s22_s14 = sshll.u32 %s680_s1, 4  ;;  %s473_s15 = smov [#allocation4]   ;;  %s23_s14 = int_to_ptr.hbm [resolvable:$true] %s22_s14 }
   0x3   :  { %17 = dma.hbm_to_smem %s15_s11, 16, %s473_s15, [#allocation6]  }
   0x4   :  { %s474_s16 = smov [#allocation7]   ;;  %s475_s18 = smov 256  }
   0x5   :  { %s24_s17 = sshll.u32 %s474_s16, 4  ;;  %s476_s19 = smov 16   ;;  %s25_s17 = int_to_ptr.vmem [resolvable:$true] %s24_s17 }
   0x6   :  { %30 = dma.hbm_to_vmem [thread:$0]  %s23_s14, 2048, %s25_s17, [#allocation5], %s475_s18, %s475_s18, %s476_s19  }
   0x7   :  { %469 = dma.done.wait [#allocation6], 16  }
   0x8   :  { %470 = vsyncadd [#allocation6], 4294967280 }
   0x9   :  { %471 = dma.done.wait [#allocation5], 2048  }
   0xa   :  { %472 = vsyncadd [#allocation5], 4294965248 }
   0xb   :  { %39 = sfence }
   0xc   :  { %v69_v0 = vld [vmem:[#allocation7 + $0x40] sm:$0xff]  ;;  %v70_v1 = vld [vmem:[#allocation7 + $0x48] sm:$0xff]  ;;  %v71_v9 = vld [vmem:[#allocation7 + $0x50] sm:$0xff]  ;;  %vm44_vm0 = vcmask 7168   ;;  %v477_v24 = vmov 0.0   ;;  %vm126_vm1 = vcmask 0  }
   0xd   :  { %v65_v2 = vld [vmem:[#allocation7 + $0x20] sm:$0xff]  ;;  %v89_v3 = vadd.f32 %v70_v1, %v69_v0  ;;  %v66_v4 = vld [vmem:[#allocation7 + $0x28] sm:$0xff]  ;;  %v72_v10 = vld [vmem:[#allocation7 + $0x58] sm:$0xff]  ;;  %49 = vst.msk [vmem:[#allocation2 + $0x20] sm:$0xff] %vm44_vm0, %v477_v24  ;;  %s150_s0 = sld [smem:[#allocation4]] }
   0xe   :  { %v61_v5 = vld [vmem:[#allocation7] sm:$0xff]  ;;  %v62_v6 = vld [vmem:[#allocation7 + $0x8] sm:$0xff]  ;;  %v83_v7 = vadd.f32 %v66_v4, %v65_v2  ;;  %v67_v11 = vld [vmem:[#allocation7 + $0x30] sm:$0xff]  ;;  %v92_v15 = vadd.f32 %v72_v10, %v71_v9  ;;  %128 = vst.msk [vmem:[#allocation3 + $0x30] sm:$0xff] %vm44_vm0, %v477_v24  ;;  %s386_s1 = sld [smem:[#allocation4 + $0x1]] }
   0xf   :  { %v77_v8 = vadd.f32 %v62_v6, %v61_v5  ;;  %90 = vadd.xlane.f32.xlu2 %v89_v3  ;;  %v68_v12 = vld [vmem:[#allocation7 + $0x38] sm:$0xff]  ;;  %v63_v13 = vld [vmem:[#allocation7 + $0x10] sm:$0xff]  ;;  %v73_v20 = vld [vmem:[#allocation7 + $0x60] sm:$0xff]  ;;  %129 = vst.msk [vmem:[#allocation3 + $0x38] sm:$0xff] %vm44_vm0, %v477_v24  ;;  %s387_s20 = sld [smem:[#allocation4 + $0x2]] }
  0x10   :  { %84 = vadd.xlane.f32.xlu1 %v83_v7  ;;  %v64_v14 = vld [vmem:[#allocation7 + $0x18] sm:$0xff]  ;;  %v86_v16 = vadd.f32 %v68_v12, %v67_v11  ;;  %v75_v18 = vld [vmem:[#allocation7 + $0x70] sm:$0xff]  ;;  %v74_v21 = vld [vmem:[#allocation7 + $0x68] sm:$0xff]  ;;  %45 = vst.msk [vmem:[#allocation2] sm:$0xff] %vm44_vm0, %v477_v24 }
  0x11   :  { %78 = vadd.xlane.f32.xlu0 %v77_v8  ;;  %v80_v17 = vadd.f32 %v64_v14, %v63_v13  ;;  %v76_v19 = vld [vmem:[#allocation7 + $0x78] sm:$0xff]  ;;  %v95_v23 = vadd.f32 %v74_v21, %v73_v20  ;;  %46 = vst.msk [vmem:[#allocation2 + $0x8] sm:$0xff] %vm44_vm0, %v477_v24 }
  0x12   :  { %v98_v22 = vadd.f32 %v76_v19, %v75_v18  ;;  %47 = vst.msk [vmem:[#allocation2 + $0x10] sm:$0xff] %vm44_vm0, %v477_v24 }
  0x13   :  { %48 = vst.msk [vmem:[#allocation2 + $0x18] sm:$0xff] %vm44_vm0, %v477_v24  ;;  %v529_v56 = vstv %s150_s0 }
  0x14   :  { %50 = vst.msk [vmem:[#allocation2 + $0x28] sm:$0xff] %vm44_vm0, %v477_v24  ;;  %v57_v25 = vld [vmem:[#allocation2 + $0x20] sm:$0xff]  ;;  %v531_v57 = vstv %s386_s1 }
  0x15   :  { %51 = vst.msk [vmem:[#allocation2 + $0x30] sm:$0xff] %vm44_vm0, %v477_v24  ;;  %v539_v2 = vstv %s387_s20 }
  0x16   :  { %52 = vst.msk [vmem:[#allocation2 + $0x38] sm:$0xff] %vm44_vm0, %v477_v24 }
  0x17   :  { %93 = vadd.xlane.f32.xlu2 %v92_v15  ;;  %121 = vst.msk [vmem:[#allocation3] sm:$0xff] %vm44_vm0, %v477_v24  ;;  %v53_v27 = vld [vmem:[#allocation2] sm:$0xff] }
  0x18   :  { %87 = vadd.xlane.f32.xlu1 %v86_v16  ;;  %122 = vst.msk [vmem:[#allocation3 + $0x8] sm:$0xff] %vm44_vm0, %v477_v24  ;;  %v54_v39 = vld [vmem:[#allocation2 + $0x8] sm:$0xff] }
  0x19   :  { %81 = vadd.xlane.f32.xlu0 %v80_v17  ;;  %123 = vst.msk [vmem:[#allocation3 + $0x10] sm:$0xff] %vm44_vm0, %v477_v24  ;;  %v55_v26 = vld [vmem:[#allocation2 + $0x10] sm:$0xff] }
  0x1a   :  { %124 = vst.msk [vmem:[#allocation3 + $0x18] sm:$0xff] %vm44_vm0, %v477_v24  ;;  %v56_v36 = vld [vmem:[#allocation2 + $0x18] sm:$0xff] }
  0x1b   :  { %125 = vst.msk [vmem:[#allocation3 + $0x20] sm:$0xff] %vm44_vm0, %v477_v24  ;;  %v58_v34 = vld [vmem:[#allocation2 + $0x28] sm:$0xff] }
  0x1c   :  { %130 = vst.msk [vmem:[#allocation3 + $0x40] sm:$0xff] %vm44_vm0, %v477_v24  ;;  %v59_v47 = vld [vmem:[#allocation2 + $0x30] sm:$0xff] }
  0x1d   :  { %131 = vst.msk [vmem:[#allocation3 + $0x48] sm:$0xff] %vm44_vm0, %v477_v24  ;;  %v60_v46 = vld [vmem:[#allocation2 + $0x38] sm:$0xff] }
  0x1e   :  { %132 = vst.msk [vmem:[#allocation3 + $0x50] sm:$0xff] %vm44_vm0, %v477_v24 }
  0x1f   :  { %127 = vst.msk [vmem:[#allocation3 + $0x28] sm:$0x1] %vm126_vm1, %v477_v24 }
  0x20   :  { %99 = vadd.xlane.f32.xlu1 %v98_v22  ;;  %133 = vst.msk [vmem:[#allocation3 + $0x58] sm:$0x1] %vm126_vm1, %v477_v24 }
  0x21   :  { %96 = vadd.xlane.f32.xlu0 %v95_v23 }
  0x82   :  { %v91_v28 = vpop.xlane.xlu2 %90 }
  0x83   :  { %v105_v29 = vadd.f32 %v91_v28, %v57_v25  ;;  %v85_v30 = vpop.xlane.xlu1 %84 }
  0x84   :  { %v79_v31 = vpop.xlane.xlu0 %78  ;;  %v103_v32 = vadd.f32 %v85_v30, %v55_v26 }
  0x85   :  { %v101_v33 = vadd.f32 %v79_v31, %v53_v27  ;;  %114 = vst.msk [vmem:[#allocation2 + $0x20] sm:$0xff] %vm44_vm0, %v105_v29 }
  0x86   :  { %112 = vst.msk [vmem:[#allocation2 + $0x10] sm:$0xff] %vm44_vm0, %v103_v32 }
  0x87   :  { %110 = vst.msk [vmem:[#allocation2] sm:$0xff] %vm44_vm0, %v101_v33 }
  0x8a   :  { %v94_v35 = vpop.xlane.xlu2 %93 }
  0x8b   :  { %v88_v37 = vpop.xlane.xlu1 %87  ;;  %v106_v41 = vadd.f32 %v94_v35, %v58_v34 }
  0x8c   :  { %v82_v38 = vpop.xlane.xlu0 %81  ;;  %v138_v40 = vld [vmem:[#allocation2 + $0x20] sm:$0xff]  ;;  %v104_v43 = vadd.f32 %v88_v37, %v56_v36 }
  0x8d   :  { %146 = vst.msk [vmem:[#allocation3 + $0x38] sm:$0xff] %vm44_vm0, %v138_v40  ;;  %v136_v42 = vld [vmem:[#allocation2 + $0x10] sm:$0xff]  ;;  %v102_v45 = vadd.f32 %v82_v38, %v54_v39 }
  0x8e   :  { %144 = vst.msk [vmem:[#allocation3 + $0x18] sm:$0xff] %vm44_vm0, %v136_v42  ;;  %v134_v44 = vld [vmem:[#allocation2] sm:$0xff] }
  0x8f   :  { %142 = vst.msk [vmem:[#allocation3 + $0x8] sm:$0xff] %vm44_vm0, %v134_v44 }
  0x90   :  { %115 = vst.msk [vmem:[#allocation2 + $0x28] sm:$0xff] %vm44_vm0, %v106_v41 }
  0x91   :  { %113 = vst.msk [vmem:[#allocation2 + $0x18] sm:$0xff] %vm44_vm0, %v104_v43 }
  0x92   :  { %111 = vst.msk [vmem:[#allocation2 + $0x8] sm:$0xff] %vm44_vm0, %v102_v45 }
  0x93   :  { %v100_v48 = vpop.xlane.xlu1 %99 }
  0x94   :  { %v97_v49 = vpop.xlane.xlu0 %96  ;;  %v108_v50 = vadd.f32 %v100_v48, %v60_v46  ;;  %v155_v52 = vld [vmem:[#allocation3 + $0x37] sm:$0xff] }
  0x95   :  { %v107_v51 = vadd.f32 %v97_v49, %v59_v47  ;;  %v173_v53 = vld [vmem:[#allocation3 + $0x38] sm:$0xff]  ;;  %v164_v59 = vmul.f32 %v529_v56, %v155_v52 }
  0x96   :  { %117 = vst.msk [vmem:[#allocation2 + $0x38] sm:$0xff] %vm44_vm0, %v108_v50  ;;  %v182_v60 = vmul.f32 %v531_v57, %v173_v53  ;;  %v151_v61 = vld [vmem:[#allocation3 + $0x7] sm:$0xff]  ;;  %v171_v63 = vld [vmem:[#allocation3 + $0x18] sm:$0xff] }
  0x97   :  { %v139_v54 = vld [vmem:[#allocation2 + $0x28] sm:$0xff]  ;;  %116 = vst.msk [vmem:[#allocation2 + $0x30] sm:$0xff] %vm44_vm0, %v107_v51  ;;  %v160_v0 = vmul.f32 %v529_v56, %v151_v61  ;;  %v180_v9 = vmul.f32 %v531_v57, %v171_v63 }
  0x98   :  { %147 = vst.msk [vmem:[#allocation3 + $0x40] sm:$0xff] %vm44_vm0, %v139_v54  ;;  %v137_v55 = vld [vmem:[#allocation2 + $0x18] sm:$0xff]  ;;  %v169_v62 = vld [vmem:[#allocation3 + $0x8] sm:$0xff]  ;;  %v190_v4 = vadd.f32 %v182_v60, %v164_v59 }
  0x99   :  { %145 = vst.msk [vmem:[#allocation3 + $0x20] sm:$0xff] %vm44_vm0, %v137_v55  ;;  %v135_v58 = vld [vmem:[#allocation2 + $0x8] sm:$0xff]  ;;  %v178_v1 = vmul.f32 %v531_v57, %v169_v62 }
  0x9a   :  { %143 = vst.msk [vmem:[#allocation3 + $0x10] sm:$0xff] %vm44_vm0, %v135_v58 }
  0x9b   :  { %v186_v14 = vadd.f32 %v178_v1, %v160_v0 }
  0x9d   :  { %v141_v3 = vld [vmem:[#allocation2 + $0x38] sm:$0xff] }
  0x9e   :  { %149 = vst.msk [vmem:[#allocation3 + $0x50] sm:$0xff] %vm44_vm0, %v141_v3  ;;  %v140_v5 = vld [vmem:[#allocation2 + $0x30] sm:$0xff] }
  0x9f   :  { %v156_v6 = vld [vmem:[#allocation3 + $0x3f] sm:$0xff]  ;;  %148 = vst.msk [vmem:[#allocation3 + $0x48] sm:$0xff] %vm44_vm0, %v140_v5 }
  0xa0   :  { %v174_v7 = vld [vmem:[#allocation3 + $0x40] sm:$0xff]  ;;  %v165_v15 = vmul.f32 %v529_v56, %v156_v6 }
  0xa1   :  { %v199_v8 = vld [vmem:[#allocation3 + $0x39] sm:$0xff]  ;;  %v198_v18 = vld [vmem:[#allocation3 + $0x21] sm:$0xff]  ;;  %v152_v19 = vld [vmem:[#allocation3 + $0xf] sm:$0xff]  ;;  %v183_v21 = vmul.f32 %v531_v57, %v174_v7 }
  0xa2   :  { %v208_v10 = vmul.f32 %v539_v2, %v199_v8  ;;  %v154_v11 = vld [vmem:[#allocation3 + $0x1f] sm:$0xff]  ;;  %v153_v20 = vld [vmem:[#allocation3 + $0x17] sm:$0xff]  ;;  %v207_v23 = vmul.f32 %v539_v2, %v198_v18  ;;  %v161_v24 = vmul.f32 %v529_v56, %v152_v19  ;;  %v195_v26 = vld [vmem:[#allocation3 + $0x9] sm:$0xff] }
  0xa3   :  { %v172_v12 = vld [vmem:[#allocation3 + $0x20] sm:$0xff]  ;;  %v163_v16 = vmul.f32 %v529_v56, %v154_v11  ;;  %v170_v25 = vld [vmem:[#allocation3 + $0x10] sm:$0xff]  ;;  %v162_v29 = vmul.f32 %v529_v56, %v153_v20  ;;  %v204_v31 = vmul.f32 %v539_v2, %v195_v26  ;;  %v191_v40 = vadd.f32 %v183_v21, %v165_v15 }
  0xa4   :  { %v197_v13 = vld [vmem:[#allocation3 + $0x19] sm:$0xff]  ;;  %v181_v17 = vmul.f32 %v531_v57, %v172_v12  ;;  %v216_v22 = vadd.f32 %v208_v10, %v190_v4  ;;  %v196_v27 = vld [vmem:[#allocation3 + $0x11] sm:$0xff]  ;;  %v179_v30 = vmul.f32 %v531_v57, %v170_v25 }
  0xa5   :  { %v206_v33 = vmul.f32 %v539_v2, %v197_v13  ;;  %v205_v34 = vmul.f32 %v539_v2, %v196_v27  ;;  %v188_v37 = vadd.f32 %v180_v9, %v162_v29  ;;  %v212_v38 = vadd.f32 %v204_v31, %v186_v14  ;;  %v176_v39 = vld [vmem:[#allocation3 + $0x50] sm:$0xff] }
  0xa6   :  { %v189_v28 = vadd.f32 %v181_v17, %v163_v16  ;;  %v392_v32 = vmul.f32 -1.442695, %v216_v22  ;;  %v187_v36 = vadd.f32 %v179_v30, %v161_v24  ;;  %v185_v41 = vmul.f32 %v531_v57, %v176_v39  ;;  %v157_v42 = vld [vmem:[#allocation3 + $0x47] sm:$0xff]  ;;  %v158_v43 = vld [vmem:[#allocation3 + $0x4f] sm:$0xff] }
  0xa7   :  { %v175_v44 = vld [vmem:[#allocation3 + $0x48] sm:$0xff]  ;;  %v214_v47 = vadd.f32 %v206_v33, %v188_v37  ;;  %v388_v48 = vmul.f32 -1.442695, %v212_v38  ;;  %v166_v51 = vmul.f32 %v529_v56, %v157_v42  ;;  %v167_v52 = vmul.f32 %v529_v56, %v158_v43  ;;  %v202_v59 = vld [vmem:[#allocation3 + $0x51] sm:$0xff] }
  0xa8   :  { %v215_v35 = vadd.f32 %v207_v23, %v189_v28  ;;  %401 = vpow2.f32 %v392_v32  ;;  %v213_v46 = vadd.f32 %v205_v34, %v187_v36  ;;  %v200_v49 = vld [vmem:[#allocation3 + $0x41] sm:$0xff]  ;;  %v201_v50 = vld [vmem:[#allocation3 + $0x49] sm:$0xff]  ;;  %v184_v53 = vmul.f32 %v531_v57, %v175_v44 }
  0xa9   :  { %v209_v54 = vmul.f32 %v539_v2, %v200_v49  ;;  %v390_v58 = vmul.f32 -1.442695, %v214_v47  ;;  %v210_v60 = vmul.f32 %v539_v2, %v201_v50  ;;  %v193_v62 = vadd.f32 %v185_v41, %v167_v52 }
  0xaa   :  { %v391_v45 = vmul.f32 -1.442695, %v215_v35  ;;  %v389_v55 = vmul.f32 -1.442695, %v213_v46  ;;  %v192_v61 = vadd.f32 %v184_v53, %v166_v51  ;;  %v211_v1 = vmul.f32 %v539_v2, %v202_v59 }
  0xab   :  { %v217_v63 = vadd.f32 %v209_v54, %v191_v40 }
  0xac   :  { %403 = vpow2.f32 %v391_v45  ;;  %v218_v56 = vadd.f32 %v210_v60, %v192_v61  ;;  %v219_v4 = vadd.f32 %v211_v1, %v193_v62 }
  0xad   :  { %405 = vpow2.f32 %v388_v48  ;;  %v393_v3 = vmul.f32 -1.442695, %v217_v63 }
  0xae   :  { %407 = vpow2.f32 %v389_v55  ;;  %v402_v0 = vpop.eup %401  ;;  %v394_v5 = vmul.f32 -1.442695, %v218_v56  ;;  %v395_v2 = vmul.f32 -1.442695, %v219_v4 }
  0xaf   :  { %409 = vpow2.f32 %v390_v58  ;;  %v248_v57 = vadd.f32 1.0, %v402_v0 }
  0xb0   :  { %411 = vpow2.f32 %v393_v3 }
  0xb1   :  { %413 = vrcp.f32 %v248_v57  ;;  %v321_v12 = vand.u32 2147483647, %v248_v57  ;;  %v323_v13 = vand.u32 2147483648, %v248_v57  ;;  %vm317_vm2 = vweird.f32 %v248_v57 }
  0xb2   :  { %v404_v6 = vpop.eup %403  ;;  %415 = vpow2.f32 %v394_v5 }
  0xb3   :  { %v406_v7 = vpop.eup %405  ;;  %v563_v8 = vadd.f32 1.0, %v404_v6  ;;  %vm576_vm3 = vcmp.eq.f32.partialorder %v321_v12, 8.507059e+37  ;;  %v324_v23 = vor.u32 1.1754944e-38, %v323_v13 }
  0xb4   :  { %v408_v9 = vpop.eup %407  ;;  %v565_v10 = vadd.f32 1.0, %v406_v7 }
  0xb5   :  { %v410_v11 = vpop.eup %409  ;;  %417 = vrcp.f32 %v563_v8  ;;  %v568_v14 = vadd.f32 1.0, %v408_v9  ;;  %v306_v18 = vand.u32 2147483647, %v563_v8  ;;  %v308_v19 = vand.u32 2147483648, %v563_v8 }
  0xb6   :  { %v570_v15 = vadd.f32 1.0, %v410_v11  ;;  %419 = vrcp.f32 %v565_v10  ;;  %v412_v16 = vpop.eup %411  ;;  %vm302_vm4 = vweird.f32 %v563_v8  ;;  %v261_v24 = vand.u32 2147483647, %v565_v10 }
  0xb7   :  { %v414_v17 = vpop.eup %413  ;;  %421 = vrcp.f32 %v568_v14  ;;  %vm257_vm5 = vweird.f32 %v565_v10  ;;  %v263_v27 = vand.u32 2147483648, %v565_v10  ;;  %v585_v28 = vadd.f32 1.0, %v412_v16 }
  0xb8   :  { %v416_v20 = vpop.eup %415  ;;  %v313_v21 = vmul.f32 %v414_v17, %v248_v57  ;;  %423 = vpow2.f32 %v395_v2  ;;  %vm588_vm6 = vcmp.eq.f32.partialorder %v306_v18, 8.507059e+37  ;;  %v309_v32 = vor.u32 1.1754944e-38, %v308_v19 }
  0xb9   :  { %425 = vrcp.f32 %v570_v15  ;;  %v592_v33 = vadd.f32 1.0, %v416_v20  ;;  %vm318_vm7 = vweird.f32 %v414_v17  ;;  %vm272_vm8 = vweird.f32 %v568_v14 }
  0xba   :  { %v314_v26 = vsub.f32 1.0, %v313_v21  ;;  %v276_v36 = vand.u32 2147483647, %v568_v14  ;;  %vm597_vm9 = vcmp.eq.f32.partialorder %v261_v24, 8.507059e+37  ;;  %v278_v40 = vand.u32 2147483648, %v568_v14  ;;  %vm319_vm10 = vmor %vm317_vm2, %vm318_vm7 }
  0xbb   :  { %v418_v25 = vpop.eup %417  ;;  %427 = vrcp.f32 %v585_v28  ;;  %v264_v44 = vor.u32 1.1754944e-38, %v263_v27  ;;  %v291_v55 = vand.u32 2147483647, %v570_v15  ;;  %v293_v63 = vand.u32 2147483648, %v570_v15 }
  0xbc   :  { %v420_v29 = vpop.eup %419  ;;  %v298_v30 = vmul.f32 %v418_v25, %v563_v8  ;;  %v315_v34 = vmul.f32 %v414_v17, %v314_v26  ;;  %vm303_vm11 = vweird.f32 %v418_v25  ;;  %429 = vrcp.f32 %v592_v33 }
  0xbd   :  { %v253_v35 = vmul.f32 %v420_v29, %v565_v10  ;;  %v422_v37 = vpop.eup %421  ;;  %vm258_vm12 = vweird.f32 %v420_v29  ;;  %vm610_vm13 = vcmp.eq.f32.partialorder %v276_v36, 8.507059e+37  ;;  %vm304_vm14 = vmor %vm302_vm4, %vm303_vm11  ;;  %v279_v6 = vor.u32 1.1754944e-38, %v278_v40 }
  0xbe   :  { %v299_v38 = vsub.f32 1.0, %v298_v30  ;;  %v424_v41 = vpop.eup %423  ;;  %v316_v42 = vadd.f32 %v414_v17, %v315_v34  ;;  %v268_v45 = vmul.f32 %v422_v37, %v568_v14  ;;  %vm273_vm15 = vweird.f32 %v422_v37  ;;  %vm259_vm1 = vmor %vm257_vm5, %vm258_vm12 }
  0xbf   :  { %v254_v43 = vsub.f32 1.0, %v253_v35  ;;  %v426_v46 = vpop.eup %425  ;;  %v625_v0 = vadd.f32 1.0, %v424_v41  ;;  %vm287_vm4 = vweird.f32 %v570_v15  ;;  %vm292_vm5 = vcmp.eq.f32.partialorder %v291_v55, 8.507059e+37 }
  0xc0   :  { %v300_v47 = vmul.f32 %v418_v25, %v299_v38  ;;  %v320_v48 = vsel %vm319_vm10, %v414_v17, %v316_v42  ;;  %v269_v50 = vsub.f32 1.0, %v268_v45  ;;  %v283_v51 = vmul.f32 %v426_v46, %v570_v15 }
  0xc1   :  { %v255_v49 = vmul.f32 %v420_v29, %v254_v43  ;;  %v325_v52 = vsel %vm576_vm3, %v324_v23, %v320_v48  ;;  %v428_v61 = vpop.eup %427  ;;  %vm288_vm2 = vweird.f32 %v426_v46  ;;  %vm274_vm3 = vmor %vm272_vm8, %vm273_vm15  ;;  %v294_v12 = vor.u32 1.1754944e-38, %v293_v63 }
  0xc2   :  { %v301_v53 = vadd.f32 %v418_v25, %v300_v47  ;;  %376 = vst.msk [vmem:[%s681_s2 + $0x20] sm:$0xff] %vm44_vm0, %v325_v52  ;;  %v270_v59 = vmul.f32 %v422_v37, %v269_v50  ;;  %v284_v60 = vsub.f32 1.0, %v283_v51  ;;  %v430_v4 = vpop.eup %429  ;;  %v328_v7 = vmul.f32 %v428_v61, %v585_v28 }
  0xc3   :  { %v256_v58 = vadd.f32 %v420_v29, %v255_v49  ;;  %v343_v10 = vmul.f32 %v430_v4, %v592_v33  ;;  %431 = vrcp.f32 %v625_v0  ;;  %v336_v14 = vand.u32 2147483647, %v585_v28 }
  0xc4   :  { %v305_v62 = vsel %vm304_vm14, %v418_v25, %v301_v53  ;;  %v271_v3 = vadd.f32 %v422_v37, %v270_v59  ;;  %v285_v57 = vmul.f32 %v426_v46, %v284_v60  ;;  %v329_v2 = vsub.f32 1.0, %v328_v7 }
  0xc5   :  { %v310_v1 = vsel %vm588_vm6, %v309_v32, %v305_v62  ;;  %v260_v56 = vsel %vm259_vm1, %v420_v29, %v256_v58  ;;  %vm289_vm6 = vmor %vm287_vm4, %vm288_vm2  ;;  %v338_v15 = vand.u32 2147483648, %v585_v28  ;;  %v344_v16 = vsub.f32 1.0, %v343_v10 }
  0xc6   :  { %375 = vst.msk [vmem:[%s681_s2 + $0x18] sm:$0xff] %vm44_vm0, %v310_v1  ;;  %v265_v5 = vsel %vm597_vm9, %v264_v44, %v260_v56  ;;  %v275_v8 = vsel %vm274_vm3, %v422_v37, %v271_v3  ;;  %v286_v9 = vadd.f32 %v426_v46, %v285_v57  ;;  %v330_v18 = vmul.f32 %v428_v61, %v329_v2 }
  0xc7   :  { %372 = vst.msk [vmem:[%s681_s2] sm:$0xff] %vm44_vm0, %v265_v5  ;;  %v280_v11 = vsel %vm610_vm13, %v279_v6, %v275_v8  ;;  %vm333_vm7 = vweird.f32 %v428_v61  ;;  %v353_v19 = vand.u32 2147483648, %v592_v33  ;;  %v345_v20 = vmul.f32 %v430_v4, %v344_v16 }
  0xc8   :  { %v290_v13 = vsel %vm289_vm6, %v426_v46, %v286_v9  ;;  %373 = vst.msk [vmem:[%s681_s2 + $0x8] sm:$0xff] %vm44_vm0, %v280_v11  ;;  %vm348_vm8 = vweird.f32 %v430_v4  ;;  %v351_v21 = vand.u32 2147483647, %v592_v33  ;;  %v331_v22 = vadd.f32 %v428_v61, %v330_v18 }
  0xc9   :  { %v295_v17 = vsel %vm292_vm5, %v294_v12, %v290_v13  ;;  %vm332_vm9 = vweird.f32 %v585_v28  ;;  %v339_v23 = vor.u32 1.1754944e-38, %v338_v15  ;;  %v346_v24 = vadd.f32 %v430_v4, %v345_v20  ;;  %v432_v25 = vpop.eup %431 }
  0xca   :  { %374 = vst.msk [vmem:[%s681_s2 + $0x10] sm:$0xff] %vm44_vm0, %v295_v17  ;;  %vm334_vm10 = vmor %vm332_vm9, %vm333_vm7  ;;  %vm347_vm11 = vweird.f32 %v592_v33  ;;  %vm337_vm12 = vcmp.eq.f32.partialorder %v336_v14, 8.507059e+37  ;;  %v354_v27 = vor.u32 1.1754944e-38, %v353_v19  ;;  %vm352_vm14 = vcmp.eq.f32.partialorder %v351_v21, 8.507059e+37 }
  0xcb   :  { %v335_v26 = vsel %vm334_vm10, %v428_v61, %v331_v22  ;;  %vm349_vm13 = vmor %vm347_vm11, %vm348_vm8  ;;  %v358_v31 = vmul.f32 %v432_v25, %v625_v0  ;;  %v368_v33 = vand.u32 2147483648, %v625_v0  ;;  %vm363_vm15 = vweird.f32 %v432_v25 }
  0xcc   :  { %v340_v29 = vsel %vm337_vm12, %v339_v23, %v335_v26  ;;  %v350_v30 = vsel %vm349_vm13, %v430_v4, %v346_v24  ;;  %v366_v35 = vand.u32 2147483647, %v625_v0  ;;  %vm362_vm1 = vweird.f32 %v625_v0 }
  0xcd   :  { %v355_v32 = vsel %vm352_vm14, %v354_v27, %v350_v30  ;;  %377 = vst.msk [vmem:[%s681_s2 + $0x28] sm:$0xff] %vm44_vm0, %v340_v29  ;;  %v359_v28 = vsub.f32 1.0, %v358_v31  ;;  %vm364_vm2 = vmor %vm362_vm1, %vm363_vm15  ;;  %v369_v37 = vor.u32 1.1754944e-38, %v368_v33 }
  0xce   :  { %378 = vst.msk [vmem:[%s681_s2 + $0x30] sm:$0xff] %vm44_vm0, %v355_v32  ;;  %vm367_vm3 = vcmp.eq.f32.partialorder %v366_v35, 8.507059e+37 }
  0xcf   :  { %v360_v34 = vmul.f32 %v432_v25, %v359_v28 }
  0xd1   :  { %v361_v36 = vadd.f32 %v432_v25, %v360_v34 }
  0xd3   :  { %v365_v38 = vsel %vm364_vm2, %v432_v25, %v361_v36 }
  0xd4   :  { %v370_v39 = vsel %vm367_vm3, %v369_v37, %v365_v38 }
  0xd5   :  { %379 = vst.msk [vmem:[%s681_s2 + $0x38] sm:$0xff] %vm44_vm0, %v370_v39 }
  0xd6   :  { %384 = vsyncpa [#allocation5], 1 }
  0xd7   :  { %385 = vsyncpa [#allocation6], 1 }

</bundles_post_ra>
